<compile_context>
chip_gen: v7x
topology: tpu7x:2x2x1
jax: 0.10.0
libtpu: 0.0.40
codegen_flags: <defaults>
</compile_context>

<pallas_src>
import math
import jax
import jax.numpy as jnp
from jax import lax
from jax.experimental import pallas as pl
from jax.experimental.pallas import tpu as pltpu

# ---- small, module-consistent shapes ----
B, S, D = 2, 8, 32          # batch, sequence, embed_dim
NUM_HEADS = 4
D_K = D // NUM_HEADS
MLP_HIDDEN = 64             # mlp_lattent


def encoder_layer_kernel(x_ref,
                         w_bh_ref, b_bh_ref,      # fused per-(batch,head) Q|K|V projection
                         wo_bh_ref, bo_ref,       # per-(batch,head) output projection + bias
                         w1_ref, b1_ref, w2_ref, b2_ref,   # MLP
                         o_ref):
    x = x_ref[...]                                          # (B, S, D)

    inv_s = 1.0 / S
    inv_sm1 = 1.0 / (S - 1)

    def standardise(z):
        # torch: mean(dim=1), std(dim=1) with default unbiased=True (ddof=1); fused single pass.
        s1 = jnp.sum(z, axis=1, keepdims=True)
        s2 = jnp.sum(z * z, axis=1, keepdims=True)
        mean = s1 * inv_s
        var = (s2 - mean * s1) * inv_sm1                    # = (sum z^2 - S*mean^2)/(S-1)
        return (z - mean) * lax.rsqrt(var)                  # rsqrt -> EUP slot

    # ---------------- Attention sublayer ----------------
    xs = standardise(x)                                     # (B, S, D)
    # Replicate rows per (batch, head): n = b*H + h.  The head-batched projection lands the
    # result directly in head-major layout -> zero in-kernel transposes / per-head lane shuffles.
    x_rep = jnp.broadcast_to(xs[:, None], (B, NUM_HEADS, S, D)).reshape(B * NUM_HEADS, S, D)
    qkv = jnp.einsum('nsd,ndk->nsk', x_rep, w_bh_ref[...],
                     preferred_element_type=jnp.float32) + b_bh_ref[...]     # (B*H, S, 3*D_K)

    qh = qkv[:, :, 0:D_K]               # already scaled by 1/sqrt(d_k) via the packed weights
    kh = qkv[:, :, D_K:2 * D_K]
    vh = qkv[:, :, 2 * D_K:3 * D_K]

    s = jnp.einsum('nqd,nkd->nqk', qh, kh,
                   preferred_element_type=jnp.float32)                        # (B*H, S, S)
    m = jnp.max(s, axis=-1, keepdims=True)
    e = jnp.exp(s - m)
    p = e * pl.reciprocal(jnp.sum(e, axis=-1, keepdims=True), approx=False)   # softmax
    att = jnp.einsum('nqk,nkd->nqd', p, vh,
                     preferred_element_type=jnp.float32)                      # (B*H, S, D_K)

    # Head merge folded into the output projection: per-head matmul against wo[h*D_K:(h+1)*D_K, :],
    # then an unrolled sum over heads (replaces nested lane concatenates).
    o_heads = jnp.einsum('nqd,nde->nqe', att, wo_bh_ref[...],
                         preferred_element_type=jnp.float32)                  # (B*H, S, D)
    o4 = o_heads.reshape(B, NUM_HEADS, S, D)
    attn_out = o4[:, 0]
    for h in range(1, NUM_HEADS):
        attn_out = attn_out + o4[:, h]
    attn_out = attn_out + bo_ref[...]                                         # (B, S, D)
    x1 = x + attn_out                        # residual (dropout = identity in eval)

    # ---------------- MLP sublayer ----------------
    xs2 = standardise(x1).reshape(B * S, D)
    h1 = jnp.maximum(
        jnp.dot(xs2, w1_ref[...], preferred_element_type=jnp.float32) + b1_ref[...], 0.0)
    mlp = jnp.dot(h1, w2_ref[...], preferred_element_type=jnp.float32) + b2_ref[...]
    o_ref[...] = x1 + mlp.reshape(B, S, D)   # residual


def pack_attention_params(params):
    """Free wrapper-side packing: per-(batch,head) fused Q|K|V weights (1/sqrt(d_k) folded into Q)
    and per-(batch,head) output-projection weights, so the kernel needs no head rearrangement."""
    wq, bq, wk, bk, wv, bv, wo, bo, w1, b1, w2, b2 = params
    c = 1.0 / math.sqrt(D_K)

    # Column h*D_K + d of a (D, D) projection weight <-> head h, within-head dim d.
    wq_h = (wq * c).reshape(D, NUM_HEADS, D_K)
    wk_h = wk.reshape(D, NUM_HEADS, D_K)
    wv_h = wv.reshape(D, NUM_HEADS, D_K)
    w_h = jnp.transpose(jnp.concatenate([wq_h, wk_h, wv_h], axis=2), (1, 0, 2))  # (H, D, 3*D_K)
    w_bh = jnp.tile(w_h, (B, 1, 1))                                              # (B*H, D, 3*D_K)

    bq_h = (bq * c).reshape(NUM_HEADS, D_K)
    bk_h = bk.reshape(NUM_HEADS, D_K)
    bv_h = bv.reshape(NUM_HEADS, D_K)
    b_h = jnp.concatenate([bq_h, bk_h, bv_h], axis=1)                            # (H, 3*D_K)
    b_bh = jnp.tile(b_h, (B, 1))[:, None, :]                                     # (B*H, 1, 3*D_K)

    wo_bh = jnp.tile(wo.reshape(NUM_HEADS, D_K, D), (B, 1, 1))                   # (B*H, D_K, D)
    bo3 = bo.reshape(1, 1, D)
    return w_bh, b_bh, wo_bh, bo3, w1, b1, w2, b2


def encoder_layer(x, params):
    operands = (x, *pack_attention_params(params))
    return pl.pallas_call(
        encoder_layer_kernel,
        out_shape=jax.ShapeDtypeStruct((B, S, D), jnp.float32),
        in_specs=[pl.BlockSpec(memory_space=pltpu.MemorySpace.VMEM)] * len(operands),
        out_specs=pl.BlockSpec(memory_space=pltpu.MemorySpace.VMEM),
    )(*operands)


def reference(x, params):
    """Pure-JAX replica of the PyTorch forward (eval mode) for verification."""
    wq, bq, wk, bk, wv, bv, wo, bo, w1, b1, w2, b2 = params

    def standardise(z):
        mean = z.mean(axis=1, keepdims=True)
        std = jnp.std(z, axis=1, keepdims=True, ddof=1)
        return (z - mean) / std

    s = standardise(x)
    q, k, v = s @ wq + bq, s @ wk + bk, s @ wv + bv

    def split_heads(t):
        return t.reshape(B, S, NUM_HEADS, D_K).transpose(0, 2, 1, 3)

    qh, kh, vh = split_heads(q), split_heads(k), split_heads(v)
    a = jnp.einsum('bhqd,bhkd->bhqk', qh, kh) / math.sqrt(D_K)
    a = jax.nn.softmax(a, axis=-1)
    att = jnp.einsum('bhqk,bhkd->bhqd', a, vh)
    concat = att.transpose(0, 2, 1, 3).reshape(B, S, D)
    x1 = x + (concat @ wo + bo)

    s2 = standardise(x1)
    h1 = jax.nn.relu(s2 @ w1 + b1)
    return x1 + (h1 @ w2 + b2)


def init_params(key):
    # Weights stored pre-transposed as (in, out) so kernel does x @ W.
    ks = jax.random.split(key, 12)

    def w(k, shape):
        return 0.1 * jax.random.normal(k, shape, dtype=jnp.float32)

    wq, wk, wv, wo = (w(ks[i], (D, D)) for i in range(4))
    bq, bk, bv, bo = (w(ks[4 + i], (1, D)) for i in range(4))
    w1 = w(ks[8], (D, MLP_HIDDEN)); b1 = w(ks[9], (1, MLP_HIDDEN))
    w2 = w(ks[10], (MLP_HIDDEN, D)); b2 = w(ks[11], (1, D))
    return (wq, bq, wk, bk, wv, bv, wo, bo, w1, b1, w2, b2)


if __name__ == "__main__":
    key = jax.random.PRNGKey(0)
    kx, kp = jax.random.split(key)
    x = jax.random.normal(kx, (B, S, D), dtype=jnp.float32)
    params = init_params(kp)

    out = encoder_layer(x, params)
    out = jax.block_until_ready(out)

    ref = reference(x, params)
    assert out.shape == (B, S, D)
    assert jnp.allclose(out, ref, atol=1e-4, rtol=1e-4), "mismatch vs pure-JAX reference"

    print("KERNEL_OK")
</pallas_src>

<mosaic_0001>
module attributes {stable_mosaic.version = 11 : i64} {
  func.func @encoder_layer_kernel(%arg0: memref<2x8x32xf32, #tpu.memory_space<vmem>>, %arg1: memref<8x32x24xf32, #tpu.memory_space<vmem>>, %arg2: memref<8x1x24xf32, #tpu.memory_space<vmem>>, %arg3: memref<8x8x32xf32, #tpu.memory_space<vmem>>, %arg4: memref<1x1x32xf32, #tpu.memory_space<vmem>>, %arg5: memref<32x64xf32, #tpu.memory_space<vmem>>, %arg6: memref<1x64xf32, #tpu.memory_space<vmem>>, %arg7: memref<64x32xf32, #tpu.memory_space<vmem>>, %arg8: memref<1x32xf32, #tpu.memory_space<vmem>>, %arg9: memref<2x8x32xf32, #tpu.memory_space<vmem>>) attributes {dimension_semantics = [], scalar_prefetch = 0 : i64, scratch_operands = 0 : i64, tpu.core_type = #tpu.core_type<tc>} {
    %c0 = arith.constant 0 : index
    %c0_0 = arith.constant 0 : index
    %c0_1 = arith.constant 0 : index
    %0 = vector.load %arg0[%c0, %c0_0, %c0_1] : memref<2x8x32xf32, #tpu.memory_space<vmem>>, vector<2x8x32xf32>
    %cst = arith.constant dense<0.000000e+00> : vector<2x32xf32>
    %1 = vector.multi_reduction <add>, %0, %cst [1] : vector<2x8x32xf32> to vector<2x32xf32>
    %2 = vector.shape_cast %1 : vector<2x32xf32> to vector<2x1x32xf32>
    %3 = arith.mulf %0, %0 : vector<2x8x32xf32>
    %cst_2 = arith.constant dense<0.000000e+00> : vector<2x32xf32>
    %4 = vector.multi_reduction <add>, %3, %cst_2 [1] : vector<2x8x32xf32> to vector<2x32xf32>
    %5 = vector.shape_cast %4 : vector<2x32xf32> to vector<2x1x32xf32>
    %cst_3 = arith.constant 1.250000e-01 : f32
    %6 = vector.broadcast %cst_3 : f32 to vector<2x1x32xf32>
    %7 = arith.mulf %2, %6 : vector<2x1x32xf32>
    %8 = arith.mulf %7, %2 : vector<2x1x32xf32>
    %9 = arith.subf %5, %8 : vector<2x1x32xf32>
    %cst_4 = arith.constant 0.142857149 : f32
    %10 = vector.broadcast %cst_4 : f32 to vector<2x1x32xf32>
    %11 = arith.mulf %9, %10 : vector<2x1x32xf32>
    %12 = vector.broadcast %7 : vector<2x1x32xf32> to vector<2x8x32xf32>
    %13 = arith.subf %0, %12 : vector<2x8x32xf32>
    %14 = math.rsqrt %11 : vector<2x1x32xf32>
    %15 = vector.broadcast %14 : vector<2x1x32xf32> to vector<2x8x32xf32>
    %16 = arith.mulf %13, %15 : vector<2x8x32xf32>
    %17 = vector.shape_cast %16 : vector<2x8x32xf32> to vector<2x1x8x32xf32>
    %18 = vector.shape_cast %17 : vector<2x1x8x32xf32> to vector<2x1x8x32xf32>
    %19 = vector.broadcast %18 : vector<2x1x8x32xf32> to vector<2x4x8x32xf32>
    %20 = vector.shape_cast %19 : vector<2x4x8x32xf32> to vector<8x8x32xf32>
    %c0_5 = arith.constant 0 : index
    %c0_6 = arith.constant 0 : index
    %c0_7 = arith.constant 0 : index
    %21 = vector.load %arg1[%c0_5, %c0_6, %c0_7] : memref<8x32x24xf32, #tpu.memory_space<vmem>>, vector<8x32x24xf32>
    "tpu.trace_start"() <{level = 10 : i32, message = "nsd,ndk->nsk"}> : () -> ()
    %cst_8 = arith.constant dense<0.000000e+00> : vector<8x8x24xf32>
    %22 = tpu.matmul %20, %21, %cst_8 {dimension_numbers = #tpu.dot_dimension_numbers<[2], [1], [1], [2], [0, 0, 0, 1, 1, 2], [0], [0]>} : vector<8x8x32xf32>, vector<8x32x24xf32>, vector<8x8x24xf32> -> vector<8x8x24xf32>
    "tpu.trace_stop"() : () -> ()
    %c0_9 = arith.constant 0 : index
    %c0_10 = arith.constant 0 : index
    %c0_11 = arith.constant 0 : index
    %23 = vector.load %arg2[%c0_9, %c0_10, %c0_11] : memref<8x1x24xf32, #tpu.memory_space<vmem>>, vector<8x1x24xf32>
    %24 = vector.broadcast %23 : vector<8x1x24xf32> to vector<8x8x24xf32>
    %25 = arith.addf %22, %24 : vector<8x8x24xf32>
    %26 = vector.extract_strided_slice %25 {offsets = [0, 0, 0], sizes = [8, 8, 8], strides = [1, 1, 1]} : vector<8x8x24xf32> to vector<8x8x8xf32>
    %27 = vector.extract_strided_slice %25 {offsets = [0, 0, 8], sizes = [8, 8, 8], strides = [1, 1, 1]} : vector<8x8x24xf32> to vector<8x8x8xf32>
    %28 = vector.extract_strided_slice %25 {offsets = [0, 0, 16], sizes = [8, 8, 8], strides = [1, 1, 1]} : vector<8x8x24xf32> to vector<8x8x8xf32>
    "tpu.trace_start"() <{level = 10 : i32, message = "nqd,nkd->nqk"}> : () -> ()
    %cst_12 = arith.constant dense<0.000000e+00> : vector<8x8x8xf32>
    %29 = tpu.matmul %26, %27, %cst_12 {dimension_numbers = #tpu.dot_dimension_numbers<[2], [2], [1], [1], [0, 0, 0, 1, 1, 1], [0], [0]>} : vector<8x8x8xf32>, vector<8x8x8xf32>, vector<8x8x8xf32> -> vector<8x8x8xf32>
    "tpu.trace_stop"() : () -> ()
    %cst_13 = arith.constant dense<0xFF800000> : vector<8x8xf32>
    %30 = vector.multi_reduction <maximumf>, %29, %cst_13 [2] : vector<8x8x8xf32> to vector<8x8xf32>
    %31 = vector.shape_cast %30 : vector<8x8xf32> to vector<8x8x1xf32>
    %32 = vector.broadcast %31 : vector<8x8x1xf32> to vector<8x8x8xf32>
    %33 = arith.subf %29, %32 : vector<8x8x8xf32>
    %34 = math.exp %33 : vector<8x8x8xf32>
    %cst_14 = arith.constant dense<0.000000e+00> : vector<8x8xf32>
    %35 = vector.multi_reduction <add>, %34, %cst_14 [2] : vector<8x8x8xf32> to vector<8x8xf32>
    %36 = vector.shape_cast %35 : vector<8x8xf32> to vector<8x8x1xf32>
    %37 = tpu.reciprocal %36 : vector<8x8x1xf32> -> vector<8x8x1xf32>
    %38 = vector.broadcast %37 : vector<8x8x1xf32> to vector<8x8x8xf32>
    %39 = arith.mulf %34, %38 : vector<8x8x8xf32>
    "tpu.trace_start"() <{level = 10 : i32, message = "nqk,nkd->nqd"}> : () -> ()
    %cst_15 = arith.constant dense<0.000000e+00> : vector<8x8x8xf32>
    %40 = tpu.matmul %39, %28, %cst_15 {dimension_numbers = #tpu.dot_dimension_numbers<[2], [1], [1], [2], [0, 0, 0, 1, 1, 2], [0], [0]>} : vector<8x8x8xf32>, vector<8x8x8xf32>, vector<8x8x8xf32> -> vector<8x8x8xf32>
    "tpu.trace_stop"() : () -> ()
    %c0_16 = arith.constant 0 : index
    %c0_17 = arith.constant 0 : index
    %c0_18 = arith.constant 0 : index
    %41 = vector.load %arg3[%c0_16, %c0_17, %c0_18] : memref<8x8x32xf32, #tpu.memory_space<vmem>>, vector<8x8x32xf32>
    "tpu.trace_start"() <{level = 10 : i32, message = "nqd,nde->nqe"}> : () -> ()
    %cst_19 = arith.constant dense<0.000000e+00> : vector<8x8x32xf32>
    %42 = tpu.matmul %40, %41, %cst_19 {dimension_numbers = #tpu.dot_dimension_numbers<[2], [1], [1], [2], [0, 0, 0, 1, 1, 2], [0], [0]>} : vector<8x8x8xf32>, vector<8x8x32xf32>, vector<8x8x32xf32> -> vector<8x8x32xf32>
    "tpu.trace_stop"() : () -> ()
    %43 = vector.shape_cast %42 : vector<8x8x32xf32> to vector<2x4x8x32xf32>
    %44 = vector.extract_strided_slice %43 {offsets = [0, 0, 0, 0], sizes = [2, 1, 8, 32], strides = [1, 1, 1, 1]} : vector<2x4x8x32xf32> to vector<2x1x8x32xf32>
    %45 = vector.shape_cast %44 : vector<2x1x8x32xf32> to vector<2x8x32xf32>
    %46 = vector.extract_strided_slice %43 {offsets = [0, 1, 0, 0], sizes = [2, 1, 8, 32], strides = [1, 1, 1, 1]} : vector<2x4x8x32xf32> to vector<2x1x8x32xf32>
    %47 = vector.shape_cast %46 : vector<2x1x8x32xf32> to vector<2x8x32xf32>
    %48 = arith.addf %45, %47 : vector<2x8x32xf32>
    %49 = vector.extract_strided_slice %43 {offsets = [0, 2, 0, 0], sizes = [2, 1, 8, 32], strides = [1, 1, 1, 1]} : vector<2x4x8x32xf32> to vector<2x1x8x32xf32>
    %50 = vector.shape_cast %49 : vector<2x1x8x32xf32> to vector<2x8x32xf32>
    %51 = arith.addf %48, %50 : vector<2x8x32xf32>
    %52 = vector.extract_strided_slice %43 {offsets = [0, 3, 0, 0], sizes = [2, 1, 8, 32], strides = [1, 1, 1, 1]} : vector<2x4x8x32xf32> to vector<2x1x8x32xf32>
    %53 = vector.shape_cast %52 : vector<2x1x8x32xf32> to vector<2x8x32xf32>
    %54 = arith.addf %51, %53 : vector<2x8x32xf32>
    %c0_20 = arith.constant 0 : index
    %c0_21 = arith.constant 0 : index
    %c0_22 = arith.constant 0 : index
    %55 = vector.load %arg4[%c0_20, %c0_21, %c0_22] : memref<1x1x32xf32, #tpu.memory_space<vmem>>, vector<1x1x32xf32>
    %56 = vector.broadcast %55 : vector<1x1x32xf32> to vector<2x8x32xf32>
    %57 = arith.addf %54, %56 : vector<2x8x32xf32>
    %58 = arith.addf %0, %57 : vector<2x8x32xf32>
    %cst_23 = arith.constant dense<0.000000e+00> : vector<2x32xf32>
    %59 = vector.multi_reduction <add>, %58, %cst_23 [1] : vector<2x8x32xf32> to vector<2x32xf32>
    %60 = vector.shape_cast %59 : vector<2x32xf32> to vector<2x1x32xf32>
    %61 = arith.mulf %58, %58 : vector<2x8x32xf32>
    %cst_24 = arith.constant dense<0.000000e+00> : vector<2x32xf32>
    %62 = vector.multi_reduction <add>, %61, %cst_24 [1] : vector<2x8x32xf32> to vector<2x32xf32>
    %63 = vector.shape_cast %62 : vector<2x32xf32> to vector<2x1x32xf32>
    %cst_25 = arith.constant 1.250000e-01 : f32
    %64 = vector.broadcast %cst_25 : f32 to vector<2x1x32xf32>
    %65 = arith.mulf %60, %64 : vector<2x1x32xf32>
    %66 = arith.mulf %65, %60 : vector<2x1x32xf32>
    %67 = arith.subf %63, %66 : vector<2x1x32xf32>
    %cst_26 = arith.constant 0.142857149 : f32
    %68 = vector.broadcast %cst_26 : f32 to vector<2x1x32xf32>
    %69 = arith.mulf %67, %68 : vector<2x1x32xf32>
    %70 = vector.broadcast %65 : vector<2x1x32xf32> to vector<2x8x32xf32>
    %71 = arith.subf %58, %70 : vector<2x8x32xf32>
    %72 = math.rsqrt %69 : vector<2x1x32xf32>
    %73 = vector.broadcast %72 : vector<2x1x32xf32> to vector<2x8x32xf32>
    %74 = arith.mulf %71, %73 : vector<2x8x32xf32>
    %75 = vector.shape_cast %74 : vector<2x8x32xf32> to vector<16x32xf32>
    %c0_27 = arith.constant 0 : index
    %c0_28 = arith.constant 0 : index
    %76 = vector.load %arg5[%c0_27, %c0_28] : memref<32x64xf32, #tpu.memory_space<vmem>>, vector<32x64xf32>
    %cst_29 = arith.constant dense<0.000000e+00> : vector<16x64xf32>
    %77 = tpu.matmul %75, %76, %cst_29 {dimension_numbers = #tpu.dot_dimension_numbers<[1], [0], [0], [1], [0, 0, 1, 1], [], []>} : vector<16x32xf32>, vector<32x64xf32>, vector<16x64xf32> -> vector<16x64xf32>
    %c0_30 = arith.constant 0 : index
    %c0_31 = arith.constant 0 : index
    %78 = vector.load %arg6[%c0_30, %c0_31] : memref<1x64xf32, #tpu.memory_space<vmem>>, vector<1x64xf32>
    %79 = vector.broadcast %78 : vector<1x64xf32> to vector<16x64xf32>
    %80 = arith.addf %77, %79 : vector<16x64xf32>
    %cst_32 = arith.constant 0.000000e+00 : f32
    %81 = vector.broadcast %cst_32 : f32 to vector<16x64xf32>
    %82 = arith.maximumf %80, %81 : vector<16x64xf32>
    %c0_33 = arith.constant 0 : index
    %c0_34 = arith.constant 0 : index
    %83 = vector.load %arg7[%c0_33, %c0_34] : memref<64x32xf32, #tpu.memory_space<vmem>>, vector<64x32xf32>
    %cst_35 = arith.constant dense<0.000000e+00> : vector<16x32xf32>
    %84 = tpu.matmul %82, %83, %cst_35 {dimension_numbers = #tpu.dot_dimension_numbers<[1], [0], [0], [1], [0, 0, 1, 1], [], []>} : vector<16x64xf32>, vector<64x32xf32>, vector<16x32xf32> -> vector<16x32xf32>
    %c0_36 = arith.constant 0 : index
    %c0_37 = arith.constant 0 : index
    %85 = vector.load %arg8[%c0_36, %c0_37] : memref<1x32xf32, #tpu.memory_space<vmem>>, vector<1x32xf32>
    %86 = vector.broadcast %85 : vector<1x32xf32> to vector<16x32xf32>
    %87 = arith.addf %84, %86 : vector<16x32xf32>
    %88 = vector.shape_cast %87 : vector<16x32xf32> to vector<2x8x32xf32>
    %89 = arith.addf %58, %88 : vector<2x8x32xf32>
    %c0_38 = arith.constant 0 : index
    %c0_39 = arith.constant 0 : index
    %c0_40 = arith.constant 0 : index
    %90 = vector.load %arg9[%c0_38, %c0_39, %c0_40] : memref<2x8x32xf32, #tpu.memory_space<vmem>>, vector<2x8x32xf32>
    tpu.vector_store %arg9[%c0_38, %c0_39, %c0_40], %89 {strides = array<i32>} : memref<2x8x32xf32, #tpu.memory_space<vmem>>, vector<2x8x32xf32>,
    return
  }
}

</mosaic_0001>

<bundles_post_ra>
// kernel: tpu_custom_call.1
= control target key start
LH: loop header
LB: loop body
LE: loop exit
PB: predicated region body
PF: predicated region fallthrough
CT: control target
= control target key end

     0   :  { %v3452_v3 = vmov 0.0|0.0   ;;  %vm35_vm0 = vcmask 261120   ;;  %vm3453_vm1 = vmmov 0   ;;  %v3454_v11 = vmov 0.0   ;;  %s3978_s0 = inlined_call_operand.vmem [shape: f32[2,8,32], index: 0, kind: input, shape index: {}]   ;;  %s3979_s1 = inlined_call_operand.vmem [shape: f32[8,32,24], index: 1, kind: input, shape index: {}]   ;;  %s3980_s2 = inlined_call_operand.vmem [shape: f32[8,1,24], index: 2, kind: input, shape index: {}]   ;;  %s3981_s3 = inlined_call_operand.vmem [shape: f32[8,8,32], index: 3, kind: input, shape index: {}]   ;;  %s3982_s4 = inlined_call_operand.vmem [shape: f32[1,1,32], index: 4, kind: input, shape index: {}]   ;;  %s3983_s5 = inlined_call_operand.vmem [shape: f32[32,64], index: 5, kind: input, shape index: {}]   ;;  %s3984_s6 = inlined_call_operand.vmem [shape: f32[1,64], index: 6, kind: input, shape index: {}]   ;;  %s3985_s7 = inlined_call_operand.vmem [shape: f32[64,32], index: 7, kind: input, shape index: {}]   ;;  %s3986_s8 = inlined_call_operand.vmem [shape: f32[1,32], index: 8, kind: input, shape index: {}]   ;;  %s3987_s9 = inlined_call_operand.hbm [shape: f32[2,8,32], index: 9, kind: output, shape index: {}]  }
   0x1   :  { %v80_v0 = vld [vmem:[%s3979_s1] sm:$0xff]  ;;  %v81_v1 = vld [vmem:[%s3979_s1 + $0x8] sm:$0xff]  ;;  %3308 = vmatprep.subr.bf16.mxu0 %v3452_v3  ;;  %3314 = vmatprep.subr.bf16.mxu1 %v3452_v3  ;;  %v82_v6 = vld [vmem:[%s3979_s1 + $0x10] sm:$0xff] }
   0x2   :  { %v84_v2 = vld [vmem:[%s3979_s1 + $0x20] sm:$0xff]  ;;  %v3309_v4 = vpack.c.bf16 %v81_v1, %v80_v0  ;;  %v85_v5 = vld [vmem:[%s3979_s1 + $0x28] sm:$0xff]  ;;  %v83_v7 = vld [vmem:[%s3979_s1 + $0x18] sm:$0xff]  ;;  %3078 = vmatprep.mubr.msk.f32.mxu0 %vm3453_vm1, %v3454_v11  ;;  %3089 = vmatprep.mubr.msk.f32.mxu1 %vm3453_vm1, %v3454_v11 }
   0x3   :  { %v3315_v8 = vpack.c.bf16 %v85_v5, %v84_v2  ;;  %v86_v9 = vld [vmem:[%s3979_s1 + $0x30] sm:$0xff]  ;;  %v87_v10 = vld [vmem:[%s3979_s1 + $0x38] sm:$0xff]  ;;  %v3543_v12 = vld [vmem:[%s3978_s0] sm:$0xff]  ;;  %v3312_v13 = vpack.c.bf16 %v83_v7, %v82_v6 }
   0x4   :  { %3310 = vmatpush3.bf16.msra.mxu0 %v3309_v4  ;;  %v36_v14 = vsel %vm35_vm0, %v3543_v12, 0.0  ;;  %v50_v15 = vmul.f32 %v3543_v12, %v3543_v12  ;;  %v3318_v16 = vpack.c.bf16 %v87_v10, %v86_v9  ;;  %v3556_v23 = vld [vmem:[%s3978_s0 + $0x8] sm:$0xff] }
   0x5   :  { %3316 = vmatpush3.bf16.msra.mxu1 %v3315_v8  ;;  %3311 = vmatprep.subr.bf16.mxu0 %v3452_v3  ;;  %v37_v17 = vrot.slane %v36_v14, 4  ;;  %v43_v24 = vsel %vm35_vm0, %v3556_v23, 0.0  ;;  %v51_v25 = vmul.f32 %v3556_v23, %v3556_v23 }
   0x6   :  { %3317 = vmatprep.subr.bf16.mxu1 %v3452_v3  ;;  %v52_v18 = vsel %vm35_vm0, %v50_v15, 0.0  ;;  %v44_v28 = vrot.slane %v43_v24, 4 }
   0x7   :  { %v38_v19 = vadd.f32 %v37_v17, %v36_v14  ;;  %v53_v20 = vrot.slane %v52_v18, 4  ;;  %v59_v29 = vsel %vm35_vm0, %v51_v25, 0.0 }
   0x8   :  { %3313 = vmatpush3.bf16.msra.mxu0 %v3312_v13 }
   0x9   :  { %3319 = vmatpush3.bf16.msra.mxu1 %v3318_v16  ;;  %3320 = vmatprep.subr.bf16.mxu0 %v3452_v3  ;;  %v39_v21 = vrot.slane %v38_v19, 2  ;;  %v54_v22 = vadd.f32 %v53_v20, %v52_v18 }
   0xa   :  { %3326 = vmatprep.subr.bf16.mxu1 %v3452_v3 }
   0xb   :  { %v40_v26 = vadd.f32 %v39_v21, %v38_v19  ;;  %v55_v27 = vrot.slane %v54_v22, 2 }
   0xc   :  { %14 = vsyncpa [#allocation3], 0  ;;  %v45_v32 = vadd.f32 %v44_v28, %v43_v24  ;;  %v60_v33 = vrot.slane %v59_v29, 4  ;;  %v88_v53 = vld [vmem:[%s3979_s1 + $0x40] sm:$0xff]  ;;  %v89_v55 = vld [vmem:[%s3979_s1 + $0x48] sm:$0xff]  ;;  %s3455_s14 = smov 120  }
   0xd   :  { %v41_v30 = vrot.slane %v40_v26, 1  ;;  %v56_v31 = vadd.f32 %v55_v27, %v54_v22  ;;  %v92_v56 = vld [vmem:[%s3979_s1 + $0x60] sm:$0xff]  ;;  %v93_v57 = vld [vmem:[%s3979_s1 + $0x68] sm:$0xff]  ;;  %v3321_v60 = vpack.c.bf16 %v89_v55, %v88_v53  ;;  %v90_v62 = vld [vmem:[%s3979_s1 + $0x50] sm:$0xff]  ;;  %vm737_vm2 = vcmask 64512  }
   0xe   :  { %v46_v36 = vrot.slane %v45_v32, 2  ;;  %v61_v37 = vadd.f32 %v60_v33, %v59_v29  ;;  %v3327_v61 = vpack.c.bf16 %v93_v57, %v92_v56  ;;  %v91_v0 = vld [vmem:[%s3979_s1 + $0x58] sm:$0xff]  ;;  %v94_v1 = vld [vmem:[%s3979_s1 + $0x70] sm:$0xff]  ;;  %v96_v6 = vld [vmem:[%s3979_s1 + $0x80] sm:$0xff]  ;;  %vm2809_vm3 = vcmask 523264  }
   0xf   :  { %v42_v34 = vadd.f32 %v41_v30, %v40_v26  ;;  %v57_v35 = vrot.slane %v56_v31, 1  ;;  %v95_v2 = vld [vmem:[%s3979_s1 + $0x78] sm:$0xff]  ;;  %v3324_v4 = vpack.c.bf16 %v91_v0, %v90_v62  ;;  %v97_v7 = vld [vmem:[%s3979_s1 + $0x88] sm:$0xff]  ;;  %v100_v8 = vld [vmem:[%s3979_s1 + $0xa0] sm:$0xff] }
  0x10   :  { %v47_v40 = vadd.f32 %v46_v36, %v45_v32  ;;  %v62_v41 = vrot.slane %v61_v37, 2  ;;  %v3330_v5 = vpack.c.bf16 %v95_v2, %v94_v1  ;;  %v101_v9 = vld [vmem:[%s3979_s1 + $0xa8] sm:$0xff]  ;;  %v3333_v10 = vpack.c.bf16 %v97_v7, %v96_v6  ;;  %v98_v14 = vld [vmem:[%s3979_s1 + $0x90] sm:$0xff]  ;;  %v99_v15 = vld [vmem:[%s3979_s1 + $0x98] sm:$0xff] }
  0x11   :  { %v58_v38 = vadd.f32 %v57_v35, %v56_v31  ;;  %v66_v39 = vmul.f32 0.125, %v42_v34  ;;  %v3339_v13 = vpack.c.bf16 %v101_v9, %v100_v8  ;;  %v102_v16 = vld [vmem:[%s3979_s1 + $0xb0] sm:$0xff]  ;;  %v103_v17 = vld [vmem:[%s3979_s1 + $0xb8] sm:$0xff]  ;;  %v3336_v20 = vpack.c.bf16 %v99_v15, %v98_v14  ;;  %v104_v22 = vld [vmem:[%s3979_s1 + $0xc0] sm:$0xff] }
  0x12   :  { %v48_v43 = vrot.slane %v47_v40, 1  ;;  %v63_v44 = vadd.f32 %v62_v41, %v61_v37  ;;  %v3342_v21 = vpack.c.bf16 %v103_v17, %v102_v16  ;;  %v105_v24 = vld [vmem:[%s3979_s1 + $0xc8] sm:$0xff]  ;;  %v108_v25 = vld [vmem:[%s3979_s1 + $0xe0] sm:$0xff]  ;;  %v106_v30 = vld [vmem:[%s3979_s1 + $0xd0] sm:$0xff] }
  0x13   :  { %v68_v42 = vmul.f32 %v66_v39, %v42_v34  ;;  %v74_v54 = vsub.f32 %v3543_v12, %v66_v39  ;;  %v109_v26 = vld [vmem:[%s3979_s1 + $0xe8] sm:$0xff]  ;;  %v3345_v28 = vpack.c.bf16 %v105_v24, %v104_v22  ;;  %v107_v31 = vld [vmem:[%s3979_s1 + $0xd8] sm:$0xff]  ;;  %v110_v32 = vld [vmem:[%s3979_s1 + $0xf0] sm:$0xff] }
  0x14   :  { %v49_v46 = vadd.f32 %v48_v43, %v47_v40  ;;  %v64_v47 = vrot.slane %v63_v44, 1  ;;  %v3351_v29 = vpack.c.bf16 %v109_v26, %v108_v25  ;;  %v111_v33 = vld [vmem:[%s3979_s1 + $0xf8] sm:$0xff]  ;;  %v3348_v34 = vpack.c.bf16 %v107_v31, %v106_v30  ;;  %v2912_v41 = vld [vmem:[%s3980_s2 + $0x1] ss:$0 sm:$0xff]  ;;  %v2913_v43 = vld [vmem:[%s3980_s2 + $0x2] ss:$0 sm:$0xff] }
  0x15   :  { %v70_v45 = vsub.f32 %v58_v38, %v68_v42  ;;  %v3354_v35 = vpack.c.bf16 %v111_v33, %v110_v32 }
  0x16   :  { %v67_v49 = vmul.f32 0.125, %v49_v46  ;;  %v65_v50 = vadd.f32 %v64_v47, %v63_v44 }
  0x17   :  { %v72_v48 = vmul.f32 0.14285715, %v70_v45  ;;  %v2914_v45 = vld [vmem:[%s3980_s2 + $0x3] ss:$0 sm:$0xff] }
  0x18   :  { %v69_v51 = vmul.f32 %v67_v49, %v49_v46  ;;  %v75_v18 = vsub.f32 %v3556_v23, %v67_v49 }
  0x19   :  { %3388 = vrsqrt.f32 %v72_v48 }
  0x1a   :  { %v71_v52 = vsub.f32 %v65_v50, %v69_v51  ;;  %v2915_v51 = vld [vmem:[%s3980_s2 + $0x4] ss:$0 sm:$0xff] }
  0x1c   :  { %v73_v58 = vmul.f32 0.14285715, %v71_v52  ;;  %v2916_v52 = vld [vmem:[%s3980_s2 + $0x5] ss:$0 sm:$0xff] }
  0x1e   :  { %3390 = vrsqrt.f32 %v73_v58 }
  0x23   :  { %v3389_v59 = vpop.eup %3388 }
  0x24   :  { %v78_v63 = vmul.f32 %v3389_v59, %v74_v54  ;;  %v2917_v59 = vld [vmem:[%s3980_s2 + $0x6] ss:$0 sm:$0xff] }
  0x26   :  { %3079 = vmatmul.mubr.msk.f32.vlgmr.msra.gmra.mrb[0].mxu0 %vm35_vm0, %v78_v63  ;;  %3090 = vmatmul.mubr.msk.f32.vlgmr.msra.gmra.mrb[0].mxu1 %vm35_vm0, %v78_v63 }
  0x27   :  { %3322 = vmatpush3.bf16.msra.mxu0 %v3321_v60  ;;  %3328 = vmatpush3.bf16.msra.mxu1 %v3327_v61  ;;  %v2918_v60 = vld [vmem:[%s3980_s2 + $0x7] ss:$0 sm:$0xff] }
  0x28   :  { %3323 = vmatprep.subr.bf16.mxu0 %v3452_v3  ;;  %3329 = vmatprep.subr.bf16.mxu1 %v3452_v3  ;;  %v3391_v19 = vpop.eup %3390 }
  0x29   :  { %3100 = vmatprep.mubr.msk.f32.mxu0 %vm3453_vm1, %v3454_v11  ;;  %3111 = vmatprep.mubr.msk.f32.mxu1 %vm3453_vm1, %v3454_v11  ;;  %v79_v27 = vmul.f32 %v3391_v19, %v75_v18 }
  0x2b   :  { %3325 = vmatpush3.bf16.msra.mxu0 %v3324_v4  ;;  %3331 = vmatpush3.bf16.msra.mxu1 %v3330_v5 }
  0x2c   :  { %3332 = vmatprep.subr.bf16.mxu0 %v3452_v3  ;;  %3338 = vmatprep.subr.bf16.mxu1 %v3452_v3 }
  0x2e   :  { %3101 = vmatmul.mubr.msk.f32.vlgmr.msra.gmra.mrb[2].mxu0 %vm35_vm0, %v78_v63  ;;  %3112 = vmatmul.mubr.msk.f32.vlgmr.msra.gmra.mrb[2].mxu1 %vm35_vm0, %v78_v63 }
  0x2f   :  { %3334 = vmatpush3.bf16.msra.mxu0 %v3333_v10  ;;  %3340 = vmatpush3.bf16.msra.mxu1 %v3339_v13 }
  0x30   :  { %3335 = vmatprep.subr.bf16.mxu0 %v3452_v3  ;;  %3341 = vmatprep.subr.bf16.mxu1 %v3452_v3 }
  0x31   :  { %3122 = vmatprep.mubr.msk.f32.mxu0 %vm3453_vm1, %v3454_v11  ;;  %3133 = vmatprep.mubr.msk.f32.mxu1 %vm3453_vm1, %v3454_v11 }
  0x33   :  { %3337 = vmatpush3.bf16.msra.mxu0 %v3336_v20  ;;  %3343 = vmatpush3.bf16.msra.mxu1 %v3342_v21 }
  0x34   :  { %3344 = vmatprep.subr.bf16.mxu0 %v3452_v3  ;;  %3350 = vmatprep.subr.bf16.mxu1 %v3452_v3 }
  0x36   :  { %3123 = vmatmul.mubr.msk.f32.vlgmr.msra.gmra.mrb[4].mxu0 %vm35_vm0, %v79_v27  ;;  %3134 = vmatmul.mubr.msk.f32.vlgmr.msra.gmra.mrb[4].mxu1 %vm35_vm0, %v79_v27 }
  0x37   :  { %3346 = vmatpush3.bf16.msra.mxu0 %v3345_v28  ;;  %3352 = vmatpush3.bf16.msra.mxu1 %v3351_v29 }
  0x38   :  { %3347 = vmatprep.subr.bf16.mxu0 %v3452_v3  ;;  %3353 = vmatprep.subr.bf16.mxu1 %v3452_v3  ;;  %v2911_v3 = vld [vmem:[%s3980_s2] ss:$0 sm:$0xff]  ;;  %s3456_s2 = smov 112  }
  0x39   :  { %3144 = vmatprep.mubr.msk.f32.mxu0 %vm3453_vm1, %v3454_v11  ;;  %3155 = vmatprep.mubr.msk.f32.mxu1 %vm3453_vm1, %v3454_v11 }
  0x3b   :  { %3349 = vmatpush3.bf16.msra.mxu0 %v3348_v34  ;;  %3355 = vmatpush3.bf16.msra.mxu1 %v3354_v35 }
  0x3c   :  { %3158 = vmatprep.subr.mxu0 %v3454_v11  ;;  %3173 = vmatprep.subr.mxu1 %v3454_v11 }
  0x3e   :  { %3145 = vmatmul.mubr.msk.f32.vlgmr.msra.gmra.mrb[6].mxu0 %vm35_vm0, %v79_v27  ;;  %3156 = vmatmul.mubr.msk.f32.vlgmr.msra.gmra.mrb[6].mxu1 %vm35_vm0, %v79_v27 }
  0x3f   :  { %3160 = vmatprep.mubr.msk.f32.mxu0 %vm3453_vm1, %v3454_v11  ;;  %3175 = vmatprep.mubr.msk.f32.mxu1 %vm3453_vm1, %v3454_v11 }
  0xf9   :  { %v237_v36 = vpop.f32.mrb[0].mxu0  ;;  %v307_v37 = vpop.f32.mrb[0].mxu1 }
  0xfa   :  { %v3677_v38 = vadd.f32 %v2911_v3, %v237_v36  ;;  %v3080_v39 = vpop.f32.mrb[1].mxu0  ;;  %v3091_v40 = vpop.f32.mrb[1].mxu1  ;;  %v3684_v42 = vadd.f32 %v2912_v41, %v307_v37 }
  0xfc   :  { %735 = vrot.lane.b32.xlu0 %v3677_v38, %s3455_s14 }
 0x100   :  { %813 = vrot.lane.b32.xlu0 %v3684_v42, %s3455_s14 }
 0x101   :  { %v377_v44 = vpop.f32.mrb[2].mxu0  ;;  %v447_v46 = vpop.f32.mrb[2].mxu1 }
 0x102   :  { %v3694_v47 = vadd.f32 %v2913_v43, %v377_v44  ;;  %v3102_v48 = vpop.f32.mrb[3].mxu0  ;;  %v3113_v49 = vpop.f32.mrb[3].mxu1  ;;  %v3696_v50 = vadd.f32 %v2914_v45, %v447_v46 }
 0x104   :  { %890 = vrot.lane.b32.xlu1 %v3694_v47, %s3455_s14 }
 0x108   :  { %967 = vrot.lane.b32.xlu1 %v3696_v50, %s3455_s14 }
 0x109   :  { %v520_v53 = vpop.f32.mrb[4].mxu0  ;;  %v590_v54 = vpop.f32.mrb[4].mxu1 }
 0x10a   :  { %v3708_v55 = vadd.f32 %v2915_v51, %v520_v53  ;;  %v3710_v56 = vadd.f32 %v2916_v52, %v590_v54  ;;  %v3124_v57 = vpop.f32.mrb[5].mxu0  ;;  %v3135_v58 = vpop.f32.mrb[5].mxu1 }
 0x10c   :  { %1121 = vrot.lane.b32.xlu1 %v3710_v56, %s3455_s14  ;;  %1044 = vrot.lane.b32.xlu0 %v3708_v55, %s3455_s14 }
 0x111   :  { %v660_v61 = vpop.f32.mrb[6].mxu0  ;;  %v730_v62 = vpop.f32.mrb[6].mxu1 }
 0x112   :  { %v3722_v63 = vadd.f32 %v2917_v59, %v660_v61  ;;  %v3724_v0 = vadd.f32 %v2918_v60, %v730_v62  ;;  %v3146_v1 = vpop.f32.mrb[7].mxu0  ;;  %v3157_v2 = vpop.f32.mrb[7].mxu1 }
 0x114   :  { %1275 = vrot.lane.b32.xlu1 %v3724_v0, %s3455_s14  ;;  %1198 = vrot.lane.b32.xlu0 %v3722_v63, %s3455_s14 }
 0x16e   :  { %v736_v4 = vpop.permute.xlu0 %735 }
 0x16f   :  { %3159 = vmatpush3.xpose.msk.msra.mxu0 %vm737_vm2, %v736_v4 }
 0x170   :  { %3163 = vmatprep.subr.mxu0 %v3454_v11 }
 0x172   :  { %3161 = vmatmul.mubr.msk.f32.vlgmr.msra.gmra.mrb[8].mxu0 %vm737_vm2, %v3677_v38  ;;  %v814_v5 = vpop.permute.xlu0 %813 }
 0x173   :  { %3164 = vmatpush3.xpose.msk.msra.mxu0 %vm737_vm2, %v814_v5  ;;  %3165 = vmatprep.mubr.msk.f32.mxu0 %vm3453_vm1, %v3454_v11 }
 0x174   :  { %3168 = vmatprep.subr.mxu0 %v3454_v11 }
 0x176   :  { %v891_v6 = vpop.permute.xlu1 %890  ;;  %3166 = vmatmul.mubr.msk.f32.vlgmr.msra.gmra.mrb[10].mxu0 %vm737_vm2, %v3684_v42 }
 0x177   :  { %3169 = vmatpush3.xpose.msk.msra.mxu0 %vm737_vm2, %v891_v6  ;;  %3170 = vmatprep.mubr.msk.f32.mxu0 %vm3453_vm1, %v3454_v11 }
 0x178   :  { %3178 = vmatprep.subr.mxu0 %v3454_v11 }
 0x17a   :  { %v968_v7 = vpop.permute.xlu1 %967  ;;  %3171 = vmatmul.mubr.msk.f32.vlgmr.msra.gmra.mrb[12].mxu0 %vm737_vm2, %v3694_v47 }
 0x17b   :  { %3174 = vmatpush3.xpose.msk.msra.mxu1 %vm737_vm2, %v968_v7  ;;  %3180 = vmatprep.mubr.msk.f32.mxu0 %vm3453_vm1, %v3454_v11 }
 0x17c   :  { %3183 = vmatprep.subr.mxu1 %v3454_v11 }
 0x17e   :  { %3176 = vmatmul.mubr.msk.f32.vlgmr.msra.gmra.mrb[8].mxu1 %vm737_vm2, %v3696_v50  ;;  %v1122_v8 = vpop.permute.xlu1 %1121  ;;  %v1045_v9 = vpop.permute.xlu0 %1044 }
 0x17f   :  { %3179 = vmatpush3.xpose.msk.msra.mxu0 %vm737_vm2, %v1045_v9  ;;  %3184 = vmatpush3.xpose.msk.msra.mxu1 %vm737_vm2, %v1122_v8 }
 0x180   :  { %3185 = vmatprep.mubr.msk.f32.mxu1 %vm3453_vm1, %v3454_v11  ;;  %3193 = vmatprep.subr.mxu1 %v3454_v11 }
 0x181   :  { %3188 = vmatprep.subr.mxu0 %v3454_v11 }
 0x182   :  { %3181 = vmatmul.mubr.msk.f32.vlgmr.msra.gmra.mrb[14].mxu0 %vm737_vm2, %v3708_v55  ;;  %3186 = vmatmul.mubr.msk.f32.vlgmr.msra.gmra.mrb[10].mxu1 %vm737_vm2, %v3710_v56 }
 0x183   :  { %3190 = vmatprep.mubr.msk.f32.mxu0 %vm3453_vm1, %v3454_v11  ;;  %3195 = vmatprep.mubr.msk.f32.mxu1 %vm3453_vm1, %v3454_v11 }
 0x186   :  { %v1276_v10 = vpop.permute.xlu1 %1275  ;;  %v1199_v13 = vpop.permute.xlu0 %1198 }
 0x187   :  { %3189 = vmatpush3.xpose.msk.msra.mxu0 %vm737_vm2, %v1199_v13  ;;  %3194 = vmatpush3.xpose.msk.msra.mxu1 %vm737_vm2, %v1276_v10 }
 0x188   :  { %3198 = vmatprep.subr.mxu0 %v3454_v11  ;;  %3203 = vmatprep.subr.mxu1 %v3454_v11 }
 0x18a   :  { %3191 = vmatmul.mubr.msk.f32.vlgmr.msra.gmra.mrb[16].mxu0 %vm737_vm2, %v3722_v63  ;;  %3196 = vmatmul.mubr.msk.f32.vlgmr.msra.gmra.mrb[12].mxu1 %vm737_vm2, %v3724_v0 }
 0x18b   :  { %3200 = vmatprep.mubr.msk.f32.mxu0 %vm3453_vm1, %v3454_v11  ;;  %3205 = vmatprep.mubr.msk.f32.mxu1 %vm3453_vm1, %v3454_v11 }
 0x245   :  { %v808_v14 = vpop.f32.mrb[8].mxu0 }
 0x246   :  { %v3162_v15 = vpop.f32.mrb[9].mxu0  ;;  %v1351_v16 = vsel %vm737_vm2, %v808_v14, -inf }
 0x247   :  { %1352 = vmax.xlane.f32.xlu0 %v1351_v16 }
 0x249   :  { %v885_v17 = vpop.f32.mrb[10].mxu0 }
 0x24a   :  { %v3167_v18 = vpop.f32.mrb[11].mxu0  ;;  %v1354_v19 = vsel %vm737_vm2, %v885_v17, -inf }
 0x24b   :  { %1355 = vmax.xlane.f32.xlu1 %v1354_v19 }
 0x24d   :  { %v962_v20 = vpop.f32.mrb[12].mxu0 }
 0x24e   :  { %v3172_v21 = vpop.f32.mrb[13].mxu0  ;;  %v1357_v22 = vsel %vm737_vm2, %v962_v20, -inf }
 0x24f   :  { %1358 = vmax.xlane.f32.xlu0 %v1357_v22 }
 0x251   :  { %v1039_v24 = vpop.f32.mrb[8].mxu1 }
 0x252   :  { %v3177_v25 = vpop.f32.mrb[9].mxu1  ;;  %v1360_v26 = vsel %vm737_vm2, %v1039_v24, -inf }
 0x253   :  { %1361 = vmax.xlane.f32.xlu0 %v1360_v26 }
 0x255   :  { %v1116_v27 = vpop.f32.mrb[14].mxu0  ;;  %v1193_v28 = vpop.f32.mrb[10].mxu1 }
 0x256   :  { %v3182_v29 = vpop.f32.mrb[15].mxu0  ;;  %v3187_v30 = vpop.f32.mrb[11].mxu1  ;;  %v1363_v31 = vsel %vm737_vm2, %v1116_v27, -inf  ;;  %v1366_v32 = vsel %vm737_vm2, %v1193_v28, -inf }
 0x257   :  { %1364 = vmax.xlane.f32.xlu1 %v1363_v31  ;;  %1367 = vmax.xlane.f32.xlu0 %v1366_v32 }
 0x25d   :  { %v1270_v33 = vpop.f32.mrb[16].mxu0  ;;  %v1347_v34 = vpop.f32.mrb[12].mxu1 }
 0x25e   :  { %v3192_v35 = vpop.f32.mrb[17].mxu0  ;;  %v3197_v3 = vpop.f32.mrb[13].mxu1  ;;  %v1372_v36 = vsel %vm737_vm2, %v1347_v34, -inf  ;;  %v1369_v37 = vsel %vm737_vm2, %v1270_v33, -inf }
 0x25f   :  { %1373 = vmax.xlane.f32.xlu0 %v1372_v36  ;;  %1370 = vmax.xlane.f32.xlu1 %v1369_v37 }
 0x270   :  { %1439 = vrot.lane.b32.xlu1 %v3677_v38, %s3456_s2 }
 0x274   :  { %1591 = vrot.lane.b32.xlu1 %v3694_v47, %s3456_s2 }
 0x275   :  { %1515 = vrot.lane.b32.xlu0 %v3684_v42, %s3456_s2 }
 0x278   :  { %1667 = vrot.lane.b32.xlu1 %v3696_v50, %s3456_s2 }
 0x279   :  { %1743 = vrot.lane.b32.xlu0 %v3708_v55, %s3456_s2 }
 0x27c   :  { %1819 = vrot.lane.b32.xlu1 %v3710_v56, %s3456_s2 }
 0x2d4   :  { %v1353_v39 = vpop.xlane.xlu0 %1352 }
 0x2d5   :  { %v1375_v40 = vsub.f32 %v808_v14, %v1353_v39 }
 0x2d7   :  { %v1383_v41 = vmul.f32 1.442695, %v1375_v40 }
 0x2d8   :  { %v1356_v43 = vpop.xlane.xlu1 %1355 }
 0x2d9   :  { %3392 = vpow2.f32 %v1383_v41  ;;  %v1376_v38 = vsub.f32 %v885_v17, %v1356_v43 }
 0x2db   :  { %v1385_v44 = vmul.f32 1.442695, %v1376_v38 }
 0x2dc   :  { %v1359_v45 = vpop.xlane.xlu0 %1358 }
 0x2dd   :  { %3394 = vpow2.f32 %v1385_v44  ;;  %v1377_v46 = vsub.f32 %v962_v20, %v1359_v45 }
 0x2df   :  { %v1387_v42 = vmul.f32 1.442695, %v1377_v46 }
 0x2e0   :  { %v1362_v47 = vpop.xlane.xlu0 %1361 }
 0x2e1   :  { %3396 = vpow2.f32 %v1387_v42  ;;  %v1378_v48 = vsub.f32 %v1039_v24, %v1362_v47 }
 0x2e3   :  { %v3393_v49 = vpop.eup %3392  ;;  %v1389_v50 = vmul.f32 1.442695, %v1378_v48 }
 0x2e4   :  { %v1365_v51 = vpop.xlane.xlu1 %1364  ;;  %v1368_v52 = vpop.xlane.xlu0 %1367  ;;  %v1399_v53 = vsel %vm737_vm2, %v3393_v49, 0.0 }
 0x2e5   :  { %3398 = vpow2.f32 %v1389_v50  ;;  %v1379_v54 = vsub.f32 %v1116_v27, %v1365_v51  ;;  %v1380_v55 = vsub.f32 %v1193_v28, %v1368_v52  ;;  %1400 = vadd.xlane.f32.xlu1 %v1399_v53  ;;  %v2048_v50 = vld [vmem:[%s3981_s3 + $0x8] sm:$0xff]  ;;  %v2049_v51 = vld [vmem:[%s3981_s3 + $0x10] sm:$0xff] }
 0x2e7   :  { %v3395_v56 = vpop.eup %3394  ;;  %v1391_v57 = vmul.f32 1.442695, %v1379_v54  ;;  %v1393_v58 = vmul.f32 1.442695, %v1380_v55  ;;  %v2050_v54 = vld [vmem:[%s3981_s3 + $0x18] sm:$0xff] }
 0x2e8   :  { %v1402_v59 = vsel %vm737_vm2, %v3395_v56, 0.0 }
 0x2e9   :  { %3400 = vpow2.f32 %v1391_v57  ;;  %1403 = vadd.xlane.f32.xlu0 %v1402_v59  ;;  %v2051_v57 = vld [vmem:[%s3981_s3 + $0x20] sm:$0xff] }
 0x2ea   :  { %3402 = vpow2.f32 %v1393_v58 }
 0x2eb   :  { %v3397_v60 = vpop.eup %3396 }
 0x2ec   :  { %v1374_v61 = vpop.xlane.xlu0 %1373  ;;  %v1371_v62 = vpop.xlane.xlu1 %1370  ;;  %v1405_v1 = vsel %vm737_vm2, %v3397_v60, 0.0 }
 0x2ed   :  { %v1382_v2 = vsub.f32 %v1347_v34, %v1374_v61  ;;  %v1381_v4 = vsub.f32 %v1270_v33, %v1371_v62  ;;  %1406 = vadd.xlane.f32.xlu1 %v1405_v1  ;;  %v2053_v1 = vld [vmem:[%s3981_s3 + $0x30] sm:$0xff] }
 0x2ef   :  { %v3801_v5 = vpop.eup %3398  ;;  %v1397_v6 = vmul.f32 1.442695, %v1382_v2  ;;  %v1395_v7 = vmul.f32 1.442695, %v1381_v4  ;;  %v2054_v4 = vld [vmem:[%s3981_s3 + $0x38] sm:$0xff] }
 0x2f0   :  { %v1516_v8 = vpop.permute.xlu0 %1515  ;;  %v1440_v9 = vpop.permute.xlu1 %1439  ;;  %v1408_v10 = vsel %vm737_vm2, %v3801_v5, 0.0 }
 0x2f1   :  { %3404 = vpow2.f32 %v1397_v6  ;;  %3199 = vmatpush3.msra.mxu0 %v1440_v9  ;;  %3204 = vmatpush3.msra.mxu1 %v1516_v8 }
 0x2f2   :  { %3406 = vpow2.f32 %v1395_v7  ;;  %1409 = vadd.xlane.f32.xlu0 %v1408_v10  ;;  %3208 = vmatprep.subr.mxu0 %v3454_v11 }
 0x2f3   :  { %v3401_v13 = vpop.eup %3400  ;;  %3213 = vmatprep.subr.mxu1 %v3454_v11 }
 0x2f4   :  { %v3403_v14 = vpop.eup %3402  ;;  %v1411_v15 = vsel %vm737_vm2, %v3401_v13, 0.0  ;;  %v1592_v21 = vpop.permute.xlu1 %1591 }
 0x2f5   :  { %1412 = vadd.xlane.f32.xlu1 %v1411_v15  ;;  %v1414_v16 = vsel %vm737_vm2, %v3403_v14, 0.0  ;;  %v1744_v25 = vpop.permute.xlu0 %1743  ;;  %v2701_v15 = vld [vmem:[%s3983_s5 + $0x8] sm:$0xff] }
 0x2f6   :  { %1415 = vadd.xlane.f32.xlu0 %v1414_v16 }
 0x2f8   :  { %v1668_v22 = vpop.permute.xlu1 %1667 }
 0x2fb   :  { %v3809_v17 = vpop.eup %3404 }
 0x2fc   :  { %v3811_v18 = vpop.eup %3406  ;;  %v1420_v19 = vsel %vm737_vm2, %v3809_v17, 0.0  ;;  %v1820_v24 = vpop.permute.xlu1 %1819 }
 0x2fd   :  { %1421 = vadd.xlane.f32.xlu0 %v1420_v19  ;;  %v1417_v20 = vsel %vm737_vm2, %v3811_v18, 0.0  ;;  %v2794_v19 = vld [vmem:[%s3985_s7] sm:$0xff] }
 0x2fe   :  { %1418 = vadd.xlane.f32.xlu1 %v1417_v20  ;;  %v2795_v20 = vld [vmem:[%s3985_s7 + $0x8] sm:$0xff] }
 0x30f   :  { %1971 = vrot.lane.b32.xlu1 %v3724_v0, %s3456_s2 }
 0x313   :  { %1895 = vrot.lane.b32.xlu0 %v3722_v63, %s3456_s2 }
 0x372   :  { %v1401_v26 = vpop.xlane.xlu1 %1400 }
 0x373   :  { %3408 = vrcp.f32 %v1401_v26  ;;  %v2798_v26 = vld [vmem:[%s3985_s7 + $0x20] sm:$0xff] }
 0x376   :  { %v1404_v27 = vpop.xlane.xlu0 %1403 }
 0x377   :  { %3410 = vrcp.f32 %v1404_v27  ;;  %v2799_v27 = vld [vmem:[%s3985_s7 + $0x28] sm:$0xff] }
 0x37a   :  { %v1407_v28 = vpop.xlane.xlu1 %1406 }
 0x37b   :  { %3412 = vrcp.f32 %v1407_v28  ;;  %v3372_v28 = vpack.c.bf16 %v2799_v27, %v2798_v26 }
 0x37d   :  { %v3409_v29 = vpop.eup %3408 }
 0x37e   :  { %v1431_v30 = vmul.f32 %v3409_v29, %v3393_v49  ;;  %v2047_v49 = vld [vmem:[%s3981_s3] sm:$0xff] }
 0x37f   :  { %v1410_v31 = vpop.xlane.xlu0 %1409 }
 0x380   :  { %3414 = vrcp.f32 %v1410_v31  ;;  %3201 = vmatmul.mubr.msk.f32.vlgmr.msra.gmra.mrb[18].mxu0 %vm737_vm2, %v1431_v30 }
 0x381   :  { %v3411_v0 = vpop.eup %3410  ;;  %3209 = vmatpush3.msra.mxu0 %v1592_v21  ;;  %3210 = vmatprep.mubr.msk.f32.mxu0 %vm3453_vm1, %v3454_v11  ;;  %v2796_v21 = vld [vmem:[%s3985_s7 + $0x10] sm:$0xff] }
 0x382   :  { %v1432_v63 = vmul.f32 %v3411_v0, %v3395_v56  ;;  %v1413_v32 = vpop.xlane.xlu1 %1412  ;;  %3218 = vmatprep.subr.mxu0 %v3454_v11 }
 0x383   :  { %3416 = vrcp.f32 %v1413_v32  ;;  %v1416_v33 = vpop.xlane.xlu0 %1415 }
 0x384   :  { %3418 = vrcp.f32 %v1416_v33  ;;  %3206 = vmatmul.mubr.msk.f32.vlgmr.msra.gmra.mrb[14].mxu1 %vm737_vm2, %v1432_v63 }
 0x385   :  { %v3413_v34 = vpop.eup %3412  ;;  %3214 = vmatpush3.msra.mxu1 %v1668_v22  ;;  %3215 = vmatprep.mubr.msk.f32.mxu1 %vm3453_vm1, %v3454_v11  ;;  %v3364_v22 = vpack.c.bf16 %v2795_v20, %v2794_v19 }
 0x386   :  { %v1433_v35 = vmul.f32 %v3413_v34, %v3397_v60  ;;  %3223 = vmatprep.subr.mxu1 %v3454_v11  ;;  %v2052_v60 = vld [vmem:[%s3981_s3 + $0x28] sm:$0xff] }
 0x388   :  { %3211 = vmatmul.mubr.msk.f32.vlgmr.msra.gmra.mrb[20].mxu0 %vm737_vm2, %v1433_v35 }
 0x389   :  { %3219 = vmatpush3.msra.mxu0 %v1744_v25  ;;  %3220 = vmatprep.mubr.msk.f32.mxu0 %vm3453_vm1, %v3454_v11 }
 0x38a   :  { %v3415_v3 = vpop.eup %3414  ;;  %v1422_v36 = vpop.xlane.xlu0 %1421  ;;  %3228 = vmatprep.subr.mxu0 %v3454_v11 }
 0x38b   :  { %v1434_v37 = vmul.f32 %v3415_v3, %v3801_v5  ;;  %3420 = vrcp.f32 %v1422_v36  ;;  %v1419_v39 = vpop.xlane.xlu1 %1418  ;;  %v2959_v3 = vld [vmem:[%s3982_s4] ss:$0 sm:$0xff] }
 0x38c   :  { %3422 = vrcp.f32 %v1419_v39 }
 0x38d   :  { %v3417_v40 = vpop.eup %3416  ;;  %3216 = vmatmul.mubr.msk.f32.vlgmr.msra.gmra.mrb[16].mxu1 %vm737_vm2, %v1434_v37 }
 0x38e   :  { %v3419_v41 = vpop.eup %3418  ;;  %v1435_v43 = vmul.f32 %v3417_v40, %v3401_v13  ;;  %3224 = vmatpush3.msra.mxu1 %v1820_v24  ;;  %v1896_v38 = vpop.permute.xlu0 %1895  ;;  %3225 = vmatprep.mubr.msk.f32.mxu1 %vm3453_vm1, %v3454_v11  ;;  %v2797_v24 = vld [vmem:[%s3985_s7 + $0x18] sm:$0xff] }
 0x38f   :  { %v1436_v44 = vmul.f32 %v3419_v41, %v3403_v14  ;;  %3233 = vmatprep.subr.mxu1 %v3454_v11  ;;  %v1972_v45 = vpop.permute.xlu1 %1971  ;;  %v2700_v14 = vld [vmem:[%s3983_s5] sm:$0xff]  ;;  %v3368_v25 = vpack.c.bf16 %v2797_v24, %v2796_v21 }
 0x390   :  { %3221 = vmatmul.mubr.msk.f32.vlgmr.msra.gmra.mrb[22].mxu0 %vm737_vm2, %v1435_v43  ;;  %v3356_v16 = vpack.c.bf16 %v2701_v15, %v2700_v14 }
 0x391   :  { %3229 = vmatpush3.msra.mxu0 %v1896_v38  ;;  %3226 = vmatmul.mubr.msk.f32.vlgmr.msra.gmra.mrb[18].mxu1 %vm737_vm2, %v1436_v44 }
 0x392   :  { %3234 = vmatpush3.msra.mxu1 %v1972_v45  ;;  %3230 = vmatprep.mubr.msk.f32.mxu0 %vm3453_vm1, %v3454_v11 }
 0x393   :  { %3235 = vmatprep.mubr.msk.f32.mxu1 %vm3453_vm1, %v3454_v11  ;;  %3238 = vmatprep.subr.mxu0 %v3454_v11 }
 0x394   :  { %3243 = vmatprep.subr.mxu1 %v3454_v11 }
 0x395   :  { %v3421_v46 = vpop.eup %3420 }
 0x396   :  { %v3423_v42 = vpop.eup %3422  ;;  %v1438_v47 = vmul.f32 %v3421_v46, %v3809_v17  ;;  %v2703_v17 = vld [vmem:[%s3983_s5 + $0x18] sm:$0xff] }
 0x397   :  { %v1437_v48 = vmul.f32 %v3423_v42, %v3811_v18 }
 0x398   :  { %3236 = vmatmul.mubr.msk.f32.vlgmr.msra.gmra.mrb[20].mxu1 %vm737_vm2, %v1438_v47 }
 0x399   :  { %3231 = vmatmul.mubr.msk.f32.vlgmr.msra.gmra.mrb[24].mxu0 %vm737_vm2, %v1437_v48  ;;  %3245 = vmatprep.mubr.msk.f32.mxu1 %vm3453_vm1, %v3454_v11 }
 0x39a   :  { %3240 = vmatprep.mubr.msk.f32.mxu0 %vm3453_vm1, %v3454_v11  ;;  %3239 = vmatpush3.msra.mxu0 %v2047_v49 }
 0x39b   :  { %3248 = vmatprep.subr.mxu0 %v3454_v11  ;;  %3244 = vmatpush3.msra.mxu1 %v2048_v50 }
 0x39c   :  { %3253 = vmatprep.subr.mxu1 %v3454_v11 }
 0x453   :  { %v1511_v52 = vpop.f32.mrb[18].mxu0 }
 0x454   :  { %v3202_v53 = vpop.f32.mrb[19].mxu0  ;;  %3241 = vmatmul.mubr.msk.f32.vlgmr.msra.gmra.mrb[26].mxu0 %vm737_vm2, %v1511_v52 }
 0x455   :  { %3249 = vmatpush3.msra.mxu0 %v2049_v51  ;;  %3250 = vmatprep.mubr.msk.f32.mxu0 %vm3453_vm1, %v3454_v11 }
 0x456   :  { %3258 = vmatprep.subr.mxu0 %v3454_v11 }
 0x457   :  { %v1587_v55 = vpop.f32.mrb[14].mxu1 }
 0x458   :  { %v3207_v56 = vpop.f32.mrb[15].mxu1  ;;  %3246 = vmatmul.mubr.msk.f32.vlgmr.msra.gmra.mrb[22].mxu1 %vm737_vm2, %v1587_v55 }
 0x459   :  { %3254 = vmatpush3.msra.mxu1 %v2050_v54  ;;  %3255 = vmatprep.mubr.msk.f32.mxu1 %vm3453_vm1, %v3454_v11 }
 0x45a   :  { %3263 = vmatprep.subr.mxu1 %v3454_v11 }
 0x45b   :  { %v1663_v58 = vpop.f32.mrb[20].mxu0 }
 0x45c   :  { %v3212_v59 = vpop.f32.mrb[21].mxu0  ;;  %3251 = vmatmul.mubr.msk.f32.vlgmr.msra.gmra.mrb[28].mxu0 %vm737_vm2, %v1663_v58 }
 0x45d   :  { %3259 = vmatpush3.msra.mxu0 %v2051_v57  ;;  %3260 = vmatprep.mubr.msk.f32.mxu0 %vm3453_vm1, %v3454_v11 }
 0x45e   :  { %3268 = vmatprep.subr.mxu0 %v3454_v11 }
 0x460   :  { %v1739_v61 = vpop.f32.mrb[16].mxu1 }
 0x461   :  { %v3217_v62 = vpop.f32.mrb[17].mxu1  ;;  %3256 = vmatmul.mubr.msk.f32.vlgmr.msra.gmra.mrb[24].mxu1 %vm737_vm2, %v1739_v61 }
 0x462   :  { %3264 = vmatpush3.msra.mxu1 %v2052_v60  ;;  %3265 = vmatprep.mubr.msk.f32.mxu1 %vm3453_vm1, %v3454_v11 }
 0x463   :  { %v1815_v2 = vpop.f32.mrb[22].mxu0  ;;  %3273 = vmatprep.subr.mxu1 %v3454_v11 }
 0x464   :  { %v3222_v5 = vpop.f32.mrb[23].mxu0  ;;  %v1891_v6 = vpop.f32.mrb[18].mxu1  ;;  %3261 = vmatmul.mubr.msk.f32.vlgmr.msra.gmra.mrb[30].mxu0 %vm737_vm2, %v1815_v2 }
 0x465   :  { %v3227_v7 = vpop.f32.mrb[19].mxu1  ;;  %3266 = vmatmul.mubr.msk.f32.vlgmr.msra.gmra.mrb[26].mxu1 %vm737_vm2, %v1891_v6  ;;  %3269 = vmatpush3.msra.mxu0 %v2053_v1 }
 0x466   :  { %3270 = vmatprep.mubr.msk.f32.mxu0 %vm3453_vm1, %v3454_v11  ;;  %3274 = vmatpush3.msra.mxu1 %v2054_v4 }
 0x467   :  { %3275 = vmatprep.mubr.msk.f32.mxu1 %vm3453_vm1, %v3454_v11  ;;  %v2702_v11 = vld [vmem:[%s3983_s5 + $0x10] sm:$0xff]  ;;  %3357 = vmatprep.subr.bf16.mxu0 %v3356_v16 }
 0x468   :  { %v3360_v18 = vpack.c.bf16 %v2703_v17, %v2702_v11  ;;  %3365 = vmatprep.subr.bf16.mxu1 %v3364_v22 }
 0x46b   :  { %v2043_v8 = vpop.f32.mrb[20].mxu1 }
 0x46c   :  { %v1967_v9 = vpop.f32.mrb[24].mxu0  ;;  %v3237_v10 = vpop.f32.mrb[21].mxu1  ;;  %3276 = vmatmul.mubr.msk.f32.vlgmr.msra.gmra.mrb[28].mxu1 %vm737_vm2, %v2043_v8 }
 0x46d   :  { %v3232_v13 = vpop.f32.mrb[25].mxu0  ;;  %3271 = vmatmul.mubr.msk.f32.vlgmr.msra.gmra.mrb[32].mxu0 %vm737_vm2, %v1967_v9  ;;  %3367 = vmatpush3.bf16.msra.mxu1 %v3364_v22 }
 0x46e   :  { %3359 = vmatpush3.bf16.msra.mxu0 %v3356_v16  ;;  %3369 = vmatprep.subr.bf16.mxu1 %v3368_v25 }
 0x46f   :  { %3361 = vmatprep.subr.bf16.mxu0 %v3360_v18 }
 0x471   :  { %3371 = vmatpush3.bf16.msra.mxu1 %v3368_v25 }
 0x472   :  { %3363 = vmatpush3.bf16.msra.mxu0 %v3360_v18  ;;  %3373 = vmatprep.subr.bf16.mxu1 %v3372_v28 }
 0x475   :  { %3375 = vmatpush3.bf16.msra.mxu1 %v3372_v28 }
 0x527   :  { %v2124_v29 = vpop.f32.mrb[26].mxu0 }
 0x528   :  { %v3242_v30 = vpop.f32.mrb[27].mxu0 }
 0x52b   :  { %v2197_v31 = vpop.f32.mrb[22].mxu1 }
 0x52c   :  { %v2639_v0 = vadd.f32 %v2197_v31, %v2124_v29  ;;  %v3247_v63 = vpop.f32.mrb[23].mxu1 }
 0x52f   :  { %v2270_v32 = vpop.f32.mrb[28].mxu0 }
 0x530   :  { %v2641_v33 = vadd.f32 %v2639_v0, %v2270_v32  ;;  %v3252_v34 = vpop.f32.mrb[29].mxu0 }
 0x531   :  { %v2800_v34 = vld [vmem:[%s3985_s7 + $0x30] sm:$0xff] }
 0x534   :  { %v2343_v35 = vpop.f32.mrb[24].mxu1 }
 0x535   :  { %v2643_v36 = vadd.f32 %v2641_v33, %v2343_v35  ;;  %v3257_v37 = vpop.f32.mrb[25].mxu1  ;;  %v2801_v35 = vld [vmem:[%s3985_s7 + $0x38] sm:$0xff]  ;;  %s3457_s7 = smov [#allocation2]  }
 0x536   :  { %s2900_s22 = sshll.u32 %s3457_s7, 4  ;;  %s2901_s22 = int_to_ptr.vmem [resolvable:$true] %s2900_s22 }
 0x537   :  { %v2652_v39 = vadd.f32 %v2959_v3, %v2643_v36  ;;  %v2416_v40 = vpop.f32.mrb[30].mxu0  ;;  %v2960_v36 = vld [vmem:[%s3984_s6] ss:$0 sm:$0xff]  ;;  %s3428_s6 = scalar_lea.vmem %s2901_s22, 256  ;;  %p3433_p1 = scmp.lt.s32.totalorder %s2901_s22, %s2901_s22 }
 0x538   :  { %v3262_v41 = vpop.f32.mrb[31].mxu0  ;;  %v2489_v43 = vpop.f32.mrb[26].mxu1  ;;  %p3429_p0 = scmp.ne.s32.totalorder %s2901_s22, %s3428_s6  ;;  %p3434_p2 = scmp.lt.s32.totalorder %s3428_s6, %s3428_s6 }
 0x539   :  { %v3938_v38 = vadd.f32 %v2652_v39, %v3543_v12  ;;  %v2640_v44 = vadd.f32 %v2489_v43, %v2416_v40  ;;  %v3267_v45 = vpop.f32.mrb[27].mxu1 }
 0x53a   :  { %v2963_v45 = vld [vmem:[%s3986_s8] ss:$0 sm:$0xff]  ;;  %p3435_p3 = por %p3434_p2, %p3433_p1 }
 0x53b   :  { %v2656_v46 = vsel %vm35_vm0, %v3938_v38, 0.0  ;;  %v2670_v42 = vmul.f32 %v3938_v38, %v3938_v38 }
 0x53c   :  { %v2657_v47 = vrot.slane %v2656_v46, 4  ;;  %p3436_p4 = pnand %p3435_p3, %p3429_p0 }
 0x53d   :  { %v2672_v48 = vsel %vm35_vm0, %v2670_v42, 0.0 }
 0x53e   :  { %v2658_v49 = vadd.f32 %v2657_v47, %v2656_v46  ;;  %v2673_v50 = vrot.slane %v2672_v48, 4 }
 0x53f   :  { %v2635_v51 = vpop.f32.mrb[28].mxu1 }
 0x540   :  { %v2659_v52 = vrot.slane %v2658_v49, 2  ;;  %v2674_v53 = vadd.f32 %v2673_v50, %v2672_v48  ;;  %v2562_v54 = vpop.f32.mrb[32].mxu0  ;;  %v3277_v55 = vpop.f32.mrb[29].mxu1 }
 0x541   :  { %v2642_v12 = vadd.f32 %v2640_v44, %v2562_v54  ;;  %v3272_v56 = vpop.f32.mrb[33].mxu0 }
 0x542   :  { %v2675_v57 = vrot.slane %v2674_v53, 2  ;;  %v2660_v58 = vadd.f32 %v2659_v52, %v2658_v49 }
 0x543   :  { %v2644_v59 = vadd.f32 %v2642_v12, %v2635_v51 }
 0x544   :  { %v2676_v60 = vadd.f32 %v2675_v57, %v2674_v53  ;;  %v2661_v61 = vrot.slane %v2660_v58, 1 }
 0x545   :  { %v2653_v62 = vadd.f32 %v2959_v3, %v2644_v59  ;;  %v3376_v3 = vpack.c.bf16 %v2801_v35, %v2800_v34 }
 0x546   :  { %v2662_v1 = vadd.f32 %v2661_v61, %v2660_v58  ;;  %v2677_v2 = vrot.slane %v2676_v60, 1 }
 0x547   :  { %v2655_v4 = vadd.f32 %v2653_v62, %v3556_v23  ;;  %3377 = vmatprep.subr.bf16.mxu1 %v3376_v3 }
 0x548   :  { %v2686_v5 = vmul.f32 0.125, %v2662_v1  ;;  %v2678_v9 = vadd.f32 %v2677_v2, %v2676_v60  ;;  %3379 = vmatpush3.bf16.msra.mxu1 %v3376_v3 }
 0x549   :  { %v2663_v6 = vsel %vm35_vm0, %v2655_v4, 0.0  ;;  %v2671_v7 = vmul.f32 %v2655_v4, %v2655_v4 }
 0x54a   :  { %v2664_v8 = vrot.slane %v2663_v6, 4  ;;  %v2688_v10 = vmul.f32 %v2686_v5, %v2662_v1  ;;  %v2694_v28 = vsub.f32 %v3938_v38, %v2686_v5 }
 0x54b   :  { %v2679_v13 = vsel %vm35_vm0, %v2671_v7, 0.0 }
 0x54c   :  { %v2665_v14 = vadd.f32 %v2664_v8, %v2663_v6  ;;  %v2680_v15 = vrot.slane %v2679_v13, 4  ;;  %v2690_v11 = vsub.f32 %v2678_v9, %v2688_v10 }
 0x54e   :  { %v2666_v16 = vrot.slane %v2665_v14, 2  ;;  %v2681_v17 = vadd.f32 %v2680_v15, %v2679_v13  ;;  %v2692_v18 = vmul.f32 0.14285715, %v2690_v11 }
 0x550   :  { %v2667_v19 = vadd.f32 %v2666_v16, %v2665_v14  ;;  %v2682_v20 = vrot.slane %v2681_v17, 2  ;;  %3424 = vrsqrt.f32 %v2692_v18 }
 0x552   :  { %v2668_v21 = vrot.slane %v2667_v19, 1  ;;  %v2683_v23 = vadd.f32 %v2682_v20, %v2681_v17 }
 0x554   :  { %v2669_v22 = vadd.f32 %v2668_v21, %v2667_v19  ;;  %v2684_v24 = vrot.slane %v2683_v23, 1 }
 0x556   :  { %v2687_v25 = vmul.f32 0.125, %v2669_v22  ;;  %v2685_v26 = vadd.f32 %v2684_v24, %v2683_v23 }
 0x558   :  { %v2689_v27 = vmul.f32 %v2687_v25, %v2669_v22  ;;  %v2695_v63 = vsub.f32 %v2655_v4, %v2687_v25 }
 0x55a   :  { %v3425_v29 = vpop.eup %3424  ;;  %v2691_v30 = vsub.f32 %v2685_v26, %v2689_v27 }
 0x55b   :  { %v2698_v31 = vmul.f32 %v3425_v29, %v2694_v28 }
 0x55c   :  { %v2693_v0 = vmul.f32 0.14285715, %v2691_v30 }
 0x55d   :  { %3286 = vmatprep.mubr.msk.f32.mxu0 %vm35_vm0, %v2698_v31 }
 0x55e   :  { %3426 = vrsqrt.f32 %v2693_v0 }
 0x568   :  { %v3427_v32 = vpop.eup %3426 }
 0x569   :  { %v2699_v33 = vmul.f32 %v3427_v32, %v2695_v63 }
 0x56b   :  { %3287 = vmatmul.mubr.msk.f32.vlgmr.msra.gmra.mrb[34].mxu0 %vm35_vm0, %v2699_v33 }
 0x63e   :  { %v3288_v37 = vpop.f32.mrb[34].mxu0 }
 0x63f   :  { %v2789_v39 = vadd.f32 %v3288_v37, %v2960_v36  ;;  %v2783_v40 = vpop.f32.mrb[35].mxu0 }
 0x640   :  { %v2784_v41 = vadd.f32 %v2960_v36, %v2783_v40 }
 0x641   :  { %v2793_v44 = vmax.f32 %v2789_v39, 0.0 }
 0x642   :  { %v2792_v43 = vmax.f32 %v2784_v41, 0.0 }
 0x644   :  { %3305 = vmatprep.mubr.msk.f32.mxu1 %vm2809_vm3, %v2792_v43 }
 0x645   :  { %3306 = vmatmul.mubr.msk.f32.vlgmr.msra.gmra.mrb[30].mxu1 %vm2809_vm3, %v2793_v44 }
 0x718   :  { %v3307_v46 = vpop.f32.mrb[30].mxu1 }
 0x719   :  { %v2888_v42 = vadd.f32 %v3307_v46, %v2963_v45  ;;  %v2882_v47 = vpop.f32.mrb[31].mxu1 }
 0x71a   :  { %v2883_v48 = vadd.f32 %v2963_v45, %v2882_v47 }
 0x71b   :  { %v2892_v49 = vadd.f32 %v2888_v42, %v2655_v4 }
 0x71c   :  { %v2891_v50 = vadd.f32 %v2883_v48, %v3938_v38 }
 0x71d   :  { %2894 = vst.msk [vmem:[#allocation2 + $0x8] sm:$0xff] %vm35_vm0, %v2892_v49 }
 0x71e   :  { %2893 = vst.msk [vmem:[#allocation2] sm:$0xff] %vm35_vm0, %v2891_v50 }
 0x71f   :  { %3439 = shalt.err (!%p3436_p4)
}
 0x720   :  { %s3440_s24 = scalar_lea.hbm %s3987_s9, 256 }
 0x721   :  { %p3441_p5 = scmp.ne.s32.totalorder %s3987_s9, %s3440_s24  ;;  %p3444_p6 = scmp.lt.u32.totalorder %s3440_s24, %s3987_s9 }
 0x723   :  { %p3446_p7 = pnand %p3444_p6, %p3441_p5 }
 0x725   :  { %3449 = shalt.err (!%p3446_p7)
}
 0x726   :  { %s3458_s28 = smov 128   ;;  %s3459_s0 = smov 8  }
 0x727   :  { %2906 = dma.vmem_to_hbm [thread:$0]  %s2901_s22, 256, %s3987_s9, [#allocation3], %s3458_s28, %s3458_s28, %s3459_s0  }
 0x728   :  { %3450 = dma.done.wait [#allocation3], 256  }
 0x729   :  { %3451 = vsyncadd [#allocation3], 4294967040 }
 0x72a   :  { %2910 = vsyncpa [#allocation3], 1 }

</bundles_post_ra>
